<compile_context>
chip_gen: v6e
topology: v6e:2x2x1
jax: 0.10.0
libtpu: 0.0.40
codegen_flags: <defaults>
</compile_context>

<pallas_src>
import functools

import jax
import jax.numpy as jnp
from jax.experimental import pallas as pl
from jax.experimental.pallas import tpu as pltpu


def _conv3x3s2_lrelu_kernel(xs_ref, w_ref, b_ref, o_ref, acc_ref, *,
                            w_out, neg_slope):
    # xs_ref : (1, 6, TCin, L)    six tap-variant views, pixels on lanes
    # w_ref  : (1, Cout, 9*TCin)  weight block, columns ordered (kh, kw, cin)
    # b_ref  : (Cout, 1)          f32 bias
    # o_ref  : (1, Cout, P)       output tile (pixels on lanes)
    # acc_ref: (Cout, P)          f32 accumulator, resident across Cin steps
    ci = pl.program_id(1)
    tcin = xs_ref.shape[2]
    p = o_ref.shape[2]

    @pl.when(ci == 0)
    def _():
        acc_ref[...] = jnp.zeros_like(acc_ref)

    # 9 taps = contiguous, static lane slices of the 6 variants:
    #   variant v = row_phase*3 + kw   (row_phase 0 for kh in {0,2}, 1 for kh=1)
    #   lane offset = W_out for kh == 2, else 0
    psum = None
    for kh in range(3):
        rphase = 1 if kh == 1 else 0
        off = w_out if kh == 2 else 0
        for kw in range(3):
            v = rphase * 3 + kw
            t = kh * 3 + kw
            tap = xs_ref[0, v, :, off:off + p]                  # (TCin, P) bf16
            wt = w_ref[0, :, t * tcin:(t + 1) * tcin]           # (Cout, TCin)
            d = jnp.dot(wt, tap, preferred_element_type=jnp.float32)
            psum = d if psum is None else psum + d
    acc_ref[...] += psum

    @pl.when(ci == pl.num_programs(1) - 1)
    def _():
        r = acc_ref[...] + b_ref[...]                           # f32, lane bcast
        r = jnp.where(r >= 0, r, neg_slope * r)                 # LeakyReLU
        o_ref[0] = r.astype(o_ref.dtype)


def _vmem_capacity_bytes():
    try:
        return int(pltpu.get_tpu_info().vmem_capacity_bytes)
    except Exception:
        return 64 << 20            # conservative default (v7x per-core VMEM)


def _est_vmem_bytes(tcin, n_ci, cout, L, P, in_bytes, out_bytes):
    xs_blk = 2 * 6 * tcin * L * in_bytes                 # double-buffered input
    w_blk = (1 if n_ci == 1 else 2) * cout * 9 * tcin * in_bytes
    o_blk = 2 * cout * P * out_bytes
    acc = cout * P * 4
    return xs_blk + w_blk + o_blk + acc + cout * 4 + (1 << 20)


def _pick_cin_tile(cin, cout, L, P, in_bytes, out_bytes, budget):
    cands = sorted({cin} | {d for d in range(8, cin, 8) if cin % d == 0},
                   reverse=True)
    for t in cands:
        if _est_vmem_bytes(t, cin // t, cout, L, P, in_bytes, out_bytes) <= budget:
            return t
    return cands[-1]                                     # best effort


def downsampling_forward(x, weight, bias, *, neg_slope=0.01,
                         compute_dtype=jnp.bfloat16):
    """DownSampling.forward: Conv2d(C, C, 3, stride=2, padding=1) + LeakyReLU.

    x: (N, C, H, W), weight: (C, C, 3, 3) OIHW, bias: (C,)
    returns (N, C, (H+1)//2, (W+1)//2) in x.dtype.
    """
    N, Cin, H, W = x.shape
    Cout = weight.shape[0]
    H_out = (H + 1) // 2
    W_out = (W + 1) // 2
    P = H_out * W_out
    L = (H_out + 1) * W_out        # even-row variants carry one extra row

    # ---- glue (pure data movement): zero-pad + six tap-variant views --------
    # Even padded rows serve kh=0 (lane offset 0) and kh=2 (offset W_out after
    # flattening); odd rows serve kh=1.  Column variant kw pre-selects the
    # stride-2 columns, so every tap is a contiguous lane slice in the kernel.
    xpad = jnp.pad(x, ((0, 0), (0, 0), (1, 1), (1, 1))).astype(compute_dtype)
    variants = []
    for rphase in (0, 1):
        nrows = H_out + 1 if rphase == 0 else H_out
        rows = xpad[:, :, rphase::2, :][:, :, :nrows, :]
        for kw in range(3):
            cstart = 1 if kw == 2 else 0
            cols = rows[:, :, :, (kw % 2)::2][:, :, :, cstart:cstart + W_out]
            flat = cols.reshape(N, Cin, nrows * W_out)
            if nrows * W_out < L:
                flat = jnp.pad(flat, ((0, 0), (0, 0), (0, L - nrows * W_out)))
            variants.append(flat)
    xs = jnp.stack(variants, axis=1)                     # (N, 6, Cin, L) bf16

    in_b = jnp.dtype(compute_dtype).itemsize
    out_b = jnp.dtype(x.dtype).itemsize
    cap = _vmem_capacity_bytes()
    tcin = _pick_cin_tile(Cin, Cout, L, P, in_b, out_b, budget=(cap * 3) // 5)
    n_ci = Cin // tcin
    need = _est_vmem_bytes(tcin, n_ci, Cout, L, P, in_b, out_b)
    vmem_limit = int(min(max(need + (4 << 20), 32 << 20), (cap * 3) // 4))

    # weight -> (n_ci, Cout, 9*tcin); columns ordered (kh, kw, cin_local) to
    # match the kernel's tap-major slicing of the weight block.
    wmat = jnp.transpose(weight.reshape(Cout, n_ci, tcin, 3, 3),
                         (1, 0, 3, 4, 2)).reshape(n_ci, Cout, 9 * tcin)
    wmat = wmat.astype(compute_dtype)
    bmat = bias.reshape(Cout, 1).astype(jnp.float32)

    # Constant-index operands get a single VMEM buffer.
    w_mode = pl.Buffered(1) if n_ci == 1 else None
    in_specs = [
        pl.BlockSpec((1, 6, tcin, L), lambda n, ci: (n, 0, ci, 0)),
        pl.BlockSpec((1, Cout, 9 * tcin), lambda n, ci: (ci, 0, 0),
                     pipeline_mode=w_mode),
        pl.BlockSpec((Cout, 1), lambda n, ci: (0, 0),
                     pipeline_mode=pl.Buffered(1)),
    ]
    cost = pl.CostEstimate(
        flops=2 * N * Cout * 9 * Cin * P,
        transcendentals=0,
        bytes_accessed=int(xs.size * in_b + wmat.size * in_b
                           + bmat.size * 4 + N * Cout * P * out_b),
    )

    out_flat = pl.pallas_call(
        functools.partial(_conv3x3s2_lrelu_kernel, w_out=W_out,
                          neg_slope=neg_slope),
        out_shape=jax.ShapeDtypeStruct((N, Cout, P), x.dtype),
        grid=(N, n_ci),
        in_specs=in_specs,
        out_specs=pl.BlockSpec((1, Cout, P), lambda n, ci: (n, 0, 0)),
        scratch_shapes=[pltpu.VMEM((Cout, P), jnp.float32)],
        compiler_params=pltpu.CompilerParams(
            dimension_semantics=("parallel", "arbitrary"),
            vmem_limit_bytes=vmem_limit,
            allow_input_fusion=[True, False, False]),
        cost_estimate=cost,
    )(xs, wmat, bmat)

    # free reshape: output already NCHW-ordered with pixels flattened
    return out_flat.reshape(N, Cout, H_out, W_out)


if __name__ == "__main__":
    key = jax.random.PRNGKey(0)
    k_x, k_w, k_b = jax.random.split(key, 3)

    N, C, H, W = 2, 4, 16, 16
    x = jax.random.normal(k_x, (N, C, H, W), dtype=jnp.float32)
    # shapes match nn.Conv2d(C, C, 3, stride=2, padding=1)
    weight = jax.random.normal(k_w, (C, C, 3, 3), dtype=jnp.float32) * 0.1
    bias = jax.random.normal(k_b, (C,), dtype=jnp.float32) * 0.1

    out = jax.block_until_ready(downsampling_forward(x, weight, bias))

    # pure-JAX reference with matching bf16-operand / f32-accumulate precision
    ref = jax.lax.conv_general_dilated(
        x.astype(jnp.bfloat16), weight.astype(jnp.bfloat16),
        window_strides=(2, 2), padding=((1, 1), (1, 1)),
        dimension_numbers=("NCHW", "OIHW", "NCHW"),
        preferred_element_type=jnp.float32)
    ref = ref + bias[None, :, None, None]
    ref = jnp.where(ref >= 0, ref, 0.01 * ref).astype(x.dtype)

    H_out, W_out = (H + 1) // 2, (W + 1) // 2
    assert out.shape == (N, C, H_out, W_out), out.shape
    err = float(jnp.max(jnp.abs(out - ref)))
    assert jnp.allclose(out, ref, atol=5e-3, rtol=5e-3), f"mismatch: {err}"

    print("KERNEL_OK")
</pallas_src>

<mosaic_0001>
module attributes {stable_mosaic.version = 11 : i64} {
  func.func @_conv3x3s2_lrelu_kernel(%arg0: i32, %arg1: i32, %arg2: memref<1x6x4x72xbf16, #tpu.memory_space<vmem>>, %arg3: memref<1x4x36xbf16, #tpu.memory_space<vmem>>, %arg4: memref<4x1xf32, #tpu.memory_space<vmem>>, %arg5: memref<1x4x64xf32, #tpu.memory_space<vmem>>, %arg6: memref<4x64xf32, #tpu.memory_space<vmem>>) attributes {dimension_semantics = [#tpu.dimension_semantics<parallel>, #tpu.dimension_semantics<arbitrary>], iteration_bounds = array<i64: 2, 1>, scalar_prefetch = 0 : i64, scratch_operands = 1 : i64, tpu.core_type = #tpu.core_type<tc>, window_params = [{transform_indices = @transform_0, window_bounds = array<i64: 1, 6, 4, 72>}, {pipeline_mode = #tpu.pipeline_mode<synchronous>, transform_indices = @transform_1, window_bounds = array<i64: 1, 4, 36>}, {pipeline_mode = #tpu.pipeline_mode<synchronous>, transform_indices = @transform_2, window_bounds = array<i64: 4, 1>}, {transform_indices = @transform_3, window_bounds = array<i64: 1, 4, 64>}]} {
    %c0_i32 = arith.constant 0 : i32
    %0 = arith.cmpi eq, %arg1, %c0_i32 : i32
    %1 = arith.extui %0 : i1 to i32
    %c0_i32_0 = arith.constant 0 : i32
    %2 = arith.cmpi ne, %1, %c0_i32_0 : i32
    scf.if %2 {
      %cst_65 = arith.constant 0.000000e+00 : f32
      %62 = vector.broadcast %cst_65 : f32 to vector<4x64xf32>
      %c0_66 = arith.constant 0 : index
      %c0_67 = arith.constant 0 : index
      %63 = vector.load %arg6[%c0_66, %c0_67] : memref<4x64xf32, #tpu.memory_space<vmem>>, vector<4x64xf32>
      tpu.vector_store %arg6[%c0_66, %c0_67], %62 {strides = array<i32>} : memref<4x64xf32, #tpu.memory_space<vmem>>, vector<4x64xf32>,
    } else {
    }
    %c0 = arith.constant 0 : index
    %c0_1 = arith.constant 0 : index
    %c0_2 = arith.constant 0 : index
    %c0_3 = arith.constant 0 : index
    %3 = vector.load %arg2[%c0, %c0_1, %c0_2, %c0_3] : memref<1x6x4x72xbf16, #tpu.memory_space<vmem>>, vector<1x1x4x64xbf16>
    %4 = vector.shape_cast %3 : vector<1x1x4x64xbf16> to vector<4x64xbf16>
    %c0_4 = arith.constant 0 : index
    %c0_5 = arith.constant 0 : index
    %c0_6 = arith.constant 0 : index
    %5 = vector.load %arg3[%c0_4, %c0_5, %c0_6] : memref<1x4x36xbf16, #tpu.memory_space<vmem>>, vector<1x4x4xbf16>
    %6 = vector.shape_cast %5 : vector<1x4x4xbf16> to vector<4x4xbf16>
    %cst = arith.constant dense<0.000000e+00> : vector<4x64xf32>
    %7 = tpu.matmul %6, %4, %cst {dimension_numbers = #tpu.dot_dimension_numbers<[1], [0], [0], [1], [0, 0, 1, 1], [], []>} : vector<4x4xbf16>, vector<4x64xbf16>, vector<4x64xf32> -> vector<4x64xf32>
    %c0_7 = arith.constant 0 : index
    %c1 = arith.constant 1 : index
    %c0_8 = arith.constant 0 : index
    %c0_9 = arith.constant 0 : index
    %8 = vector.load %arg2[%c0_7, %c1, %c0_8, %c0_9] : memref<1x6x4x72xbf16, #tpu.memory_space<vmem>>, vector<1x1x4x64xbf16>
    %9 = vector.shape_cast %8 : vector<1x1x4x64xbf16> to vector<4x64xbf16>
    %c0_10 = arith.constant 0 : index
    %c0_11 = arith.constant 0 : index
    %c4 = arith.constant 4 : index
    %10 = vector.load %arg3[%c0_10, %c0_11, %c4] : memref<1x4x36xbf16, #tpu.memory_space<vmem>>, vector<1x4x4xbf16>
    %11 = vector.shape_cast %10 : vector<1x4x4xbf16> to vector<4x4xbf16>
    %cst_12 = arith.constant dense<0.000000e+00> : vector<4x64xf32>
    %12 = tpu.matmul %11, %9, %cst_12 {dimension_numbers = #tpu.dot_dimension_numbers<[1], [0], [0], [1], [0, 0, 1, 1], [], []>} : vector<4x4xbf16>, vector<4x64xbf16>, vector<4x64xf32> -> vector<4x64xf32>
    %13 = arith.addf %7, %12 : vector<4x64xf32>
    %c0_13 = arith.constant 0 : index
    %c2 = arith.constant 2 : index
    %c0_14 = arith.constant 0 : index
    %c0_15 = arith.constant 0 : index
    %14 = vector.load %arg2[%c0_13, %c2, %c0_14, %c0_15] : memref<1x6x4x72xbf16, #tpu.memory_space<vmem>>, vector<1x1x4x64xbf16>
    %15 = vector.shape_cast %14 : vector<1x1x4x64xbf16> to vector<4x64xbf16>
    %c0_16 = arith.constant 0 : index
    %c0_17 = arith.constant 0 : index
    %c8 = arith.constant 8 : index
    %16 = vector.load %arg3[%c0_16, %c0_17, %c8] : memref<1x4x36xbf16, #tpu.memory_space<vmem>>, vector<1x4x4xbf16>
    %17 = vector.shape_cast %16 : vector<1x4x4xbf16> to vector<4x4xbf16>
    %cst_18 = arith.constant dense<0.000000e+00> : vector<4x64xf32>
    %18 = tpu.matmul %17, %15, %cst_18 {dimension_numbers = #tpu.dot_dimension_numbers<[1], [0], [0], [1], [0, 0, 1, 1], [], []>} : vector<4x4xbf16>, vector<4x64xbf16>, vector<4x64xf32> -> vector<4x64xf32>
    %19 = arith.addf %13, %18 : vector<4x64xf32>
    %c0_19 = arith.constant 0 : index
    %c3 = arith.constant 3 : index
    %c0_20 = arith.constant 0 : index
    %c0_21 = arith.constant 0 : index
    %20 = vector.load %arg2[%c0_19, %c3, %c0_20, %c0_21] : memref<1x6x4x72xbf16, #tpu.memory_space<vmem>>, vector<1x1x4x64xbf16>
    %21 = vector.shape_cast %20 : vector<1x1x4x64xbf16> to vector<4x64xbf16>
    %c0_22 = arith.constant 0 : index
    %c0_23 = arith.constant 0 : index
    %c12 = arith.constant 12 : index
    %22 = vector.load %arg3[%c0_22, %c0_23, %c12] : memref<1x4x36xbf16, #tpu.memory_space<vmem>>, vector<1x4x4xbf16>
    %23 = vector.shape_cast %22 : vector<1x4x4xbf16> to vector<4x4xbf16>
    %cst_24 = arith.constant dense<0.000000e+00> : vector<4x64xf32>
    %24 = tpu.matmul %23, %21, %cst_24 {dimension_numbers = #tpu.dot_dimension_numbers<[1], [0], [0], [1], [0, 0, 1, 1], [], []>} : vector<4x4xbf16>, vector<4x64xbf16>, vector<4x64xf32> -> vector<4x64xf32>
    %25 = arith.addf %19, %24 : vector<4x64xf32>
    %c0_25 = arith.constant 0 : index
    %c4_26 = arith.constant 4 : index
    %c0_27 = arith.constant 0 : index
    %c0_28 = arith.constant 0 : index
    %26 = vector.load %arg2[%c0_25, %c4_26, %c0_27, %c0_28] : memref<1x6x4x72xbf16, #tpu.memory_space<vmem>>, vector<1x1x4x64xbf16>
    %27 = vector.shape_cast %26 : vector<1x1x4x64xbf16> to vector<4x64xbf16>
    %c0_29 = arith.constant 0 : index
    %c0_30 = arith.constant 0 : index
    %c16 = arith.constant 16 : index
    %28 = vector.load %arg3[%c0_29, %c0_30, %c16] : memref<1x4x36xbf16, #tpu.memory_space<vmem>>, vector<1x4x4xbf16>
    %29 = vector.shape_cast %28 : vector<1x4x4xbf16> to vector<4x4xbf16>
    %cst_31 = arith.constant dense<0.000000e+00> : vector<4x64xf32>
    %30 = tpu.matmul %29, %27, %cst_31 {dimension_numbers = #tpu.dot_dimension_numbers<[1], [0], [0], [1], [0, 0, 1, 1], [], []>} : vector<4x4xbf16>, vector<4x64xbf16>, vector<4x64xf32> -> vector<4x64xf32>
    %31 = arith.addf %25, %30 : vector<4x64xf32>
    %c0_32 = arith.constant 0 : index
    %c5 = arith.constant 5 : index
    %c0_33 = arith.constant 0 : index
    %c0_34 = arith.constant 0 : index
    %32 = vector.load %arg2[%c0_32, %c5, %c0_33, %c0_34] : memref<1x6x4x72xbf16, #tpu.memory_space<vmem>>, vector<1x1x4x64xbf16>
    %33 = vector.shape_cast %32 : vector<1x1x4x64xbf16> to vector<4x64xbf16>
    %c0_35 = arith.constant 0 : index
    %c0_36 = arith.constant 0 : index
    %c20 = arith.constant 20 : index
    %34 = vector.load %arg3[%c0_35, %c0_36, %c20] : memref<1x4x36xbf16, #tpu.memory_space<vmem>>, vector<1x4x4xbf16>
    %35 = vector.shape_cast %34 : vector<1x4x4xbf16> to vector<4x4xbf16>
    %cst_37 = arith.constant dense<0.000000e+00> : vector<4x64xf32>
    %36 = tpu.matmul %35, %33, %cst_37 {dimension_numbers = #tpu.dot_dimension_numbers<[1], [0], [0], [1], [0, 0, 1, 1], [], []>} : vector<4x4xbf16>, vector<4x64xbf16>, vector<4x64xf32> -> vector<4x64xf32>
    %37 = arith.addf %31, %36 : vector<4x64xf32>
    %c0_38 = arith.constant 0 : index
    %c0_39 = arith.constant 0 : index
    %c0_40 = arith.constant 0 : index
    %c8_41 = arith.constant 8 : index
    %38 = vector.load %arg2[%c0_38, %c0_39, %c0_40, %c8_41] : memref<1x6x4x72xbf16, #tpu.memory_space<vmem>>, vector<1x1x4x64xbf16>
    %39 = vector.shape_cast %38 : vector<1x1x4x64xbf16> to vector<4x64xbf16>
    %c0_42 = arith.constant 0 : index
    %c0_43 = arith.constant 0 : index
    %c24 = arith.constant 24 : index
    %40 = vector.load %arg3[%c0_42, %c0_43, %c24] : memref<1x4x36xbf16, #tpu.memory_space<vmem>>, vector<1x4x4xbf16>
    %41 = vector.shape_cast %40 : vector<1x4x4xbf16> to vector<4x4xbf16>
    %cst_44 = arith.constant dense<0.000000e+00> : vector<4x64xf32>
    %42 = tpu.matmul %41, %39, %cst_44 {dimension_numbers = #tpu.dot_dimension_numbers<[1], [0], [0], [1], [0, 0, 1, 1], [], []>} : vector<4x4xbf16>, vector<4x64xbf16>, vector<4x64xf32> -> vector<4x64xf32>
    %43 = arith.addf %37, %42 : vector<4x64xf32>
    %c0_45 = arith.constant 0 : index
    %c1_46 = arith.constant 1 : index
    %c0_47 = arith.constant 0 : index
    %c8_48 = arith.constant 8 : index
    %44 = vector.load %arg2[%c0_45, %c1_46, %c0_47, %c8_48] : memref<1x6x4x72xbf16, #tpu.memory_space<vmem>>, vector<1x1x4x64xbf16>
    %45 = vector.shape_cast %44 : vector<1x1x4x64xbf16> to vector<4x64xbf16>
    %c0_49 = arith.constant 0 : index
    %c0_50 = arith.constant 0 : index
    %c28 = arith.constant 28 : index
    %46 = vector.load %arg3[%c0_49, %c0_50, %c28] : memref<1x4x36xbf16, #tpu.memory_space<vmem>>, vector<1x4x4xbf16>
    %47 = vector.shape_cast %46 : vector<1x4x4xbf16> to vector<4x4xbf16>
    %cst_51 = arith.constant dense<0.000000e+00> : vector<4x64xf32>
    %48 = tpu.matmul %47, %45, %cst_51 {dimension_numbers = #tpu.dot_dimension_numbers<[1], [0], [0], [1], [0, 0, 1, 1], [], []>} : vector<4x4xbf16>, vector<4x64xbf16>, vector<4x64xf32> -> vector<4x64xf32>
    %49 = arith.addf %43, %48 : vector<4x64xf32>
    %c0_52 = arith.constant 0 : index
    %c2_53 = arith.constant 2 : index
    %c0_54 = arith.constant 0 : index
    %c8_55 = arith.constant 8 : index
    %50 = vector.load %arg2[%c0_52, %c2_53, %c0_54, %c8_55] : memref<1x6x4x72xbf16, #tpu.memory_space<vmem>>, vector<1x1x4x64xbf16>
    %51 = vector.shape_cast %50 : vector<1x1x4x64xbf16> to vector<4x64xbf16>
    %c0_56 = arith.constant 0 : index
    %c0_57 = arith.constant 0 : index
    %c32 = arith.constant 32 : index
    %52 = vector.load %arg3[%c0_56, %c0_57, %c32] : memref<1x4x36xbf16, #tpu.memory_space<vmem>>, vector<1x4x4xbf16>
    %53 = vector.shape_cast %52 : vector<1x4x4xbf16> to vector<4x4xbf16>
    %cst_58 = arith.constant dense<0.000000e+00> : vector<4x64xf32>
    %54 = tpu.matmul %53, %51, %cst_58 {dimension_numbers = #tpu.dot_dimension_numbers<[1], [0], [0], [1], [0, 0, 1, 1], [], []>} : vector<4x4xbf16>, vector<4x64xbf16>, vector<4x64xf32> -> vector<4x64xf32>
    %55 = arith.addf %49, %54 : vector<4x64xf32>
    %c0_59 = arith.constant 0 : index
    %c0_60 = arith.constant 0 : index
    %56 = vector.load %arg6[%c0_59, %c0_60] : memref<4x64xf32, #tpu.memory_space<vmem>>, vector<4x64xf32>
    %57 = arith.addf %56, %55 : vector<4x64xf32>
    %c0_61 = arith.constant 0 : index
    %c0_62 = arith.constant 0 : index
    %58 = vector.load %arg6[%c0_61, %c0_62] : memref<4x64xf32, #tpu.memory_space<vmem>>, vector<4x64xf32>
    tpu.vector_store %arg6[%c0_61, %c0_62], %57 {strides = array<i32>} : memref<4x64xf32, #tpu.memory_space<vmem>>, vector<4x64xf32>,
    %c0_i32_63 = arith.constant 0 : i32
    %59 = arith.cmpi eq, %arg1, %c0_i32_63 : i32
    %60 = arith.extui %59 : i1 to i32
    %c0_i32_64 = arith.constant 0 : i32
    %61 = arith.cmpi ne, %60, %c0_i32_64 : i32
    scf.if %61 {
      %c0_65 = arith.constant 0 : index
      %c0_66 = arith.constant 0 : index
      %62 = vector.load %arg6[%c0_65, %c0_66] : memref<4x64xf32, #tpu.memory_space<vmem>>, vector<4x64xf32>
      %c0_67 = arith.constant 0 : index
      %c0_68 = arith.constant 0 : index
      %63 = vector.load %arg4[%c0_67, %c0_68] : memref<4x1xf32, #tpu.memory_space<vmem>>, vector<4x1xf32>
      %64 = vector.broadcast %63 : vector<4x1xf32> to vector<4x64xf32>
      %65 = arith.addf %62, %64 : vector<4x64xf32>
      %cst_69 = arith.constant 0.000000e+00 : f32
      %66 = vector.broadcast %cst_69 : f32 to vector<4x64xf32>
      %67 = arith.cmpf oge, %65, %66 : vector<4x64xf32>
      %cst_70 = arith.constant 0.00999999977 : f32
      %68 = vector.broadcast %cst_70 : f32 to vector<4x64xf32>
      %69 = arith.mulf %68, %65 : vector<4x64xf32>
      %70 = arith.select %67, %65, %69 : vector<4x64xi1>, vector<4x64xf32>
      %c0_71 = arith.constant 0 : index
      %c0_72 = arith.constant 0 : index
      %c0_73 = arith.constant 0 : index
      %71 = vector.load %arg5[%c0_71, %c0_72, %c0_73] : memref<1x4x64xf32, #tpu.memory_space<vmem>>, vector<1x4x64xf32>
      %72 = vector.shape_cast %71 : vector<1x4x64xf32> to vector<4x64xf32>
      %73 = vector.shape_cast %70 : vector<4x64xf32> to vector<1x4x64xf32>
      tpu.vector_store %arg5[%c0_71, %c0_72, %c0_73], %73 {strides = array<i32>} : memref<1x4x64xf32, #tpu.memory_space<vmem>>, vector<1x4x64xf32>,
    } else {
    }
    return
  }
  func.func @transform_0(%arg0: i32, %arg1: i32) -> (i32, i32, i32, i32) {
    %c0_i32 = arith.constant 0 : i32
    %c0_i32_0 = arith.constant 0 : i32
    %c0_i32_1 = arith.constant 0 : i32
    return %arg0, %c0_i32, %arg1, %c0_i32_0 : i32, i32, i32, i32
  }
  func.func @transform_1(%arg0: i32, %arg1: i32) -> (i32, i32, i32) {
    %c0_i32 = arith.constant 0 : i32
    %c0_i32_0 = arith.constant 0 : i32
    %c0_i32_1 = arith.constant 0 : i32
    return %arg1, %c0_i32, %c0_i32_0 : i32, i32, i32
  }
  func.func @transform_2(%arg0: i32, %arg1: i32) -> (i32, i32) {
    %c0_i32 = arith.constant 0 : i32
    %c0_i32_0 = arith.constant 0 : i32
    %c0_i32_1 = arith.constant 0 : i32
    return %c0_i32, %c0_i32_0 : i32, i32
  }
  func.func @transform_3(%arg0: i32, %arg1: i32) -> (i32, i32, i32) {
    %c0_i32 = arith.constant 0 : i32
    %c0_i32_0 = arith.constant 0 : i32
    %c0_i32_1 = arith.constant 0 : i32
    return %arg0, %c0_i32, %c0_i32_0 : i32, i32, i32
  }
}

</mosaic_0001>

<bundles_post_ra>
// kernel: tpu_custom_call.1
= control target key start
LH: loop header
LB: loop body
LE: loop exit
PB: predicated region body
PF: predicated region fallthrough
CT: control target
= control target key end

     0   :  { %8 = vsyncpa [#allocation4], 0  ;;  %s1456_s0 = inlined_call_operand.hbm [shape: bf16[2,6,4,72], index: 0, kind: input, shape index: {}]   ;;  %s1457_s1 = inlined_call_operand.vmem [shape: bf16[1,4,36], index: 1, kind: input, shape index: {}]   ;;  %s1458_s2 = inlined_call_operand.vmem [shape: f32[4,1], index: 2, kind: input, shape index: {}]   ;;  %s1459_s3 = inlined_call_operand.hbm [shape: f32[2,4,64], index: 3, kind: output, shape index: {}]  }
   0x1   :  { %10 = vsyncpa [#allocation4 + $0x1], 0 }
   0x2   :  { %11 = vsyncpa [#allocation5], 0 }
   0x3   :  { %13 = vsyncpa [#allocation5 + $0x1], 0  ;;  %s1248_s12 = smov 0   ;;  %s1250_s13 = smov 0  }
   0x4   :  { %s1252_s14 = smov 0   ;;  %s1254_s15 = smov 0  }
   0x5   :  { %s1256_s16 = smov 0   ;;  %s1258_s17 = smov 0  }
   0x6 LB: > { %s911_s18 = sadd.s32 4294967295, %s1210_s17   ;;  %s912_s19 = sadd.s32 4294967294, %s1210_s17   ;;  %s1210_s17 = sphi %s1258_s17, %s19_s17   ;;  %s1206_s16 = sphi %s1256_s16, %s1470_s16   ;;  %s1202_s15 = sphi %s1254_s15, %s1469_s15   ;;  %s1198_s14 = sphi %s1252_s14, %s1468_s14   ;;  %s1194_s13 = sphi %s1250_s13, %s1467_s13   ;;  %s1190_s12 = sphi %s1248_s12, %s1466_s12  }
   0x7   : > { %s31_s20 = sadd.s32 1, %s1206_s16  ;;  %s40_s21 = sadd.s32 1, %s1198_s14 }
   0x8   : > { %p33_p0 = scmp.ge.s32.totalorder %s31_s20, 2  ;;  %p47_p1 = scmp.ne.s32.totalorder %s1198_s14, %s1194_s13 }
   0x9   : > { %p48_p2 = scmp.eq.s32.totalorder %s1210_s17, 0  ;;  %p53_p3 = scmp.ne.s32.totalorder %s1194_s13, %s1190_s12 }
   0xa   : > { %s1472_s20 = smov (%p33_p0, %s31_s20), 0  ;;  %p54_p5 = scmp.eq.s32.totalorder %s911_s18, 0 }
   0xb   : > { %p1289_p4 = por %p48_p2, %p47_p1  ;;  %s35_s23 = ssub.s32 %s1206_s16, %s1472_s20 }
   0xc   : > { %p124_p6 = scmp.eq.s32.totalorder %s911_s18, 1  ;;  %p38_p7 = scmp.eq.s32.totalorder %s35_s23, 0 }
   0xd   : > { %p1295_p8 = por %p54_p5, %p53_p3  ;;  %p130_p10 = scmp.eq.s32.totalorder %s912_s19, 1 }
   0xe   : > { %p1299_p9 = por %p124_p6, %p47_p1  ;;  %p1036_p13 = scmp.lt.s32.totalorder %s1210_s17, 2 }
   0xf   : > { %s1304_s26 = scalar_select %p38_p7, %s1198_s14, %s40_s21  }
  0x10   : > { %p1306_p11 = por %p130_p10, %p53_p3  ;;  %s160_s28 = sand.u32 1, %s1198_s14  }
  0x11   : > { %s1021_s29 = smul.u32 12, %s160_s28  ;;  %p1316_p0 = pnand %p1036_p13, %p1289_p4 }
  0x12   : > { %s1022_s30 = smul.u32 192, %s1206_s16  ;;  %p917_p1 = scmp.ge.s32.totalorder %s1210_s17, 1 }
  0x13   : > { %s164_s8 = scalar_lea.vmem [#allocation3], %s1021_s29  ;;  %s161_s10 = scalar_lea.sflag [#allocation4], %s160_s28 }
  0x14   : > { %s171_s7 = scalar_lea.hbm %s1456_s0, %s1022_s30  ;;  %s172_s9 = sshll.u32 %s164_s8, 4  ;;  %s173_s9 = int_to_ptr.vmem [resolvable:$true] %s172_s9 }
  0x15   : > { %p1104_p2 = pneg %p1316_p0  ;;  %s1115_s11 = scalar_lea.vmem %s173_s9, 192 }
  0x16   : > { %p1116_p3 = scmp.ne.s32.totalorder %s173_s9, %s1115_s11  ;;  %s1212_s18 = smov [#allocation3]  }
  0x17   : > { %s1120_s19 = sshll.u32 %s1212_s18, 4  ;;  %s1121_s19 = int_to_ptr.vmem [resolvable:$false] %s1120_s19 }
  0x18   : > { %p1118_p5 = pnand %p1116_p3, %p1104_p2  ;;  %s1122_s21 = scalar_lea.vmem %s1121_s19, 384 }
  0x19   : > { %p1123_p4 = scmp.lt.s32.totalorder %s173_s9, %s1121_s19  ;;  %p1124_p7 = scmp.lt.s32.totalorder %s1122_s21, %s1115_s11 }
  0x1a   : > { %p1119_p6 = pneg %p1118_p5 }
  0x1b   : > { %p1125_p10 = por %p1124_p7, %p1123_p4 }
  0x1d   : > { %p1126_p13 = pnand %p1125_p10, %p1119_p6 }
  0x1f   : > { %1129 = shalt.err (!%p1126_p13)
}
  0x20   : > { %s1213_s22 = smov 32   ;;  %s1214_s23 = smov 2  }
  0x21   : > { %1031 = dma.hbm_to_vmem [thread:$0]  (!%p1316_p0), %s171_s7, 192, %s173_s9, %s161_s10, %s1213_s22, %s1213_s22, %s1214_s23  }
  0x22   : > { %p180_p12 = scmp.lt.s32.totalorder %s1210_s17, 3 }
  0x24   : > { %p181_p2 = pnand %p917_p1, %p180_p12 }
  0x25   : > { %s1332_s28 = sand.u32 (!%p181_p2), 1, %s1194_s13  }
  0x26   : > { %184 = sbr.rel (%p181_p2) target bundleno = 423 (0x1a7), region = 32  ;;  %s187_s30 = scalar_lea.sflag (!%p181_p2), [#allocation4], %s1332_s28 }
  0x27   : > { %s1023_s29 = smul.u32 (!%p181_p2), 12, %s1332_s28 }
  0x29   : > { %s1336_s5 = scalar_lea.vmem (!%p181_p2), [#allocation3], %s1023_s29 }
  0x2b   : > { %1181 = dma.done.wait (%p1295_p8), %s187_s30, 192  }
  0x2c   : > { %1183 = vsyncadd (%p1295_p8), %s187_s30, 4294967104  ;;  %v236_v0 = vlaneseq  ;;  %v1215_v1 = vmov 1983009808   ;;  %v1216_v3 = vmov 0.0   ;;  %vm1217_vm0 = vmmov 0   ;;  %s1218_s8 = smov 116  }
  0x2d   : > { %v234_v2 = vunpack.c.l.s4 %v1215_v1  ;;  %973 = vmatprep.subr.bf16.mxu1 %v1216_v3  ;;  %967 = vmatprep.subr.bf16.mxu0 %v1216_v3  ;;  %vm246_vm1 = vcmask 1041408   ;;  %v229_v7 = vld [vmem:[%s1457_s1] sm:$0x3]  ;;  %v228_v10 = vld [vmem:[%s1336_s5] sm:$0x3]  ;;  %s1219_s9 = smov 124  }
  0x2e   : > { %v237_v4 = vshrl.u32 %v236_v0, 7  ;;  %975 = vmatprep.mubr.msk.bf16.mxu1 %vm1217_vm0, %v1216_v3  ;;  %969 = vmatprep.mubr.msk.bf16.mxu0 %vm1217_vm0, %v1216_v3  ;;  %v926_v8 = vld.sshfl [vmem:[%s1457_s1] sm:$0x3 pattern:$0x76325410]  ;;  %v294_v11 = vsel %vm246_vm1, %v228_v10, 0 }
  0x2f   : > { %v235_v5 = vunpack.c.0.s8 %v234_v2  ;;  %407 = vrot.lane.b32.xlu1 %v926_v8, %s1218_s8  ;;  %974 = vmatpush3.bf16.msra.mxu1 %v294_v11  ;;  %vm242_vm2 = vcmask 31744   ;;  %v919_v12 = vld [vmem:[%s1336_s5 + $0x2] sm:$0x3]  ;;  %v925_v14 = vld [vmem:[%s1336_s5 + $0x6] sm:$0x3]  ;;  %s1220_s10 = smov 112  }
  0x30   : > { %v248_v13 = vsel %vm246_vm1, %v919_v12, 0  ;;  %985 = vmatprep.subr.bf16.mxu1 %v1216_v3  ;;  %v413_v15 = vsel %vm246_vm1, %v925_v14, 0  ;;  %s1221_s11 = smov 120   ;;  %s1222_s18 = smov 108   ;;  %v791_v19 = vld [vmem:[%s1458_s2] sm:$0xf] }
  0x31   : > { %v238_v6 = vsub.s32 %v235_v5, %v237_v4  ;;  %968 = vmatpush3.bf16.msra.mxu0 %v248_v13  ;;  %v935_v16 = vld.sshfl [vmem:[%s1336_s5] sm:$0x3 pattern:$0x76325410]  ;;  %s1223_s19 = smov 104   ;;  %s1224_s21 = smov 100  }
  0x32   : > { %976 = vmatmul.mubr.msk.bf16.vlgmr.msra.gmra.mxu1 %vm242_vm2, %v229_v7  ;;  %979 = vmatprep.subr.bf16.mxu0 %v1216_v3  ;;  %v939_v17 = vld.sshfl [vmem:[%s1336_s5 + $0x2] sm:$0x3 pattern:$0x76325410]  ;;  %s1225_s29 = smov 96   ;;  %v1226_v20 = vmov 0  }
  0x33   : > { %v239_v9 = vrot.slane %v229_v7, %v238_v6  ;;  %467 = vrot.lane.b32.xlu1 %v926_v8, %s1220_s10  ;;  %986 = vmatpush3.bf16.msra.mxu1 %v413_v15  ;;  %v943_v18 = vld.sshfl [vmem:[%s1336_s5 + $0x4] sm:$0x3 pattern:$0x76325410]  ;;  %v931_v21 = vld [vmem:[%s1336_s5 + $0xa] sm:$0x3] }
  0x34   : > { %987 = vmatprep.mubr.msk.bf16.mxu1 %vm1217_vm0, %v1216_v3  ;;  %997 = vmatprep.subr.bf16.mxu1 %v1216_v3  ;;  %v922_v22 = vld [vmem:[%s1336_s5 + $0x4] sm:$0x3]  ;;  %v533_v23 = vsel %vm246_vm1, %v931_v21, 0  ;;  %v928_v29 = vld [vmem:[%s1336_s5 + $0x8] sm:$0x3]  ;;  %vm226_vm3 = vcmask 519168  }
  0x35   : > { %240 = vrot.lane.b32.xlu0 %v239_v9, %s1219_s9  ;;  %1100 = vset.pattern.permute.xlu1 %v1226_v20  ;;  %v353_v25 = vsel %vm246_vm1, %v922_v22, 0  ;;  %v473_v31 = vsel %vm246_vm1, %v928_v29, 0  ;;  %227 = vst.msk [vmem:[#allocation2] sm:$0xf] %vm226_vm3, %v1216_v3  ;;  %s918_s30 = sshll.u32 %s1332_s28, 2  ;;  %s946_s5 = sshll.u32 %s1202_s15, 6 }
  0x36   : > { %1101 = vset.pattern.permute.xlu0 %v1226_v20  ;;  %s216_s24 = scalar_lea.vmem [#allocation6], %s918_s30  ;;  %s1413_s8 = scalar_lea.hbm %s1459_s3, %s946_s5 }
  0x37   : > { %527 = vrot.lane.b32.xlu1 %v926_v8, %s1222_s18  ;;  %s816_s4 = sshll.u32 %s216_s24, 4  ;;  %s803_s9 = scalar_lea.sflag [#allocation5], %s1332_s28  ;;  %s817_s4 = int_to_ptr.vmem [resolvable:$true] %s816_s4 }
  0x38   : > { %s1130_s10 = scalar_lea.vmem %s817_s4, 64  ;;  %s1227_s15 = smov [#allocation6]  }
  0x39   : > { %347 = vrot.lane.b32.xlu0 %v926_v8, %s1221_s11  ;;  %p1131_p8 = scmp.ne.s32.totalorder %s817_s4, %s1130_s10 }
  0x3b   : > { %665 = vrot.lane.b32.xlu1 %v939_v17, %s1221_s11  ;;  %p1132_p12 = pnand %p1131_p8, %p1299_p9 }
  0x3c   : > { %v783_v17 = vld [vmem:[#allocation2] sm:$0xf] }
  0x3d   : > { %596 = vrot.lane.b32.xlu0 %v935_v16, %s1221_s11  ;;  %p1133_p0 = pneg %p1132_p12 }
  0x3f   : > { %655 = vrot.lane.b32.xlu1 %v926_v8, %s1224_s21 }
  0x41   : > { %586 = vrot.lane.b32.xlu0 %v926_v8, %s1223_s19 }
  0x43   : > { %794 = vperm.xlu1 %1100, %v791_v19  }
  0x45   : > { %734 = vrot.lane.b32.xlu0 %v943_v18, %s1221_s11  ;;  %s1134_s11 = sshll.u32 %s1227_s15, 4  ;;  %s1135_s11 = int_to_ptr.vmem [resolvable:$false] %s1134_s11 }
  0x46   : > { %s1136_s18 = scalar_lea.vmem %s1135_s11, 128  ;;  %p1137_p1 = scmp.lt.s32.totalorder %s817_s4, %s1135_s11 }
  0x47   : > { %p1138_p3 = scmp.lt.s32.totalorder %s1136_s18, %s1130_s10 }
  0x49   : > { %724 = vrot.lane.b32.xlu0 %v926_v8, %s1225_s29  ;;  %p1139_p5 = por %p1138_p3, %p1137_p1 }
  0x4b   : > { %p1140_p6 = pnand %p1139_p5, %p1133_p0 }
  0xa1   : > { %v408_v24 = vpop.permute.xlu1 %407 }
  0xa2   : > { %988 = vmatmul.mubr.msk.bf16.vlgmr.msra.gmra.mxu1 %vm242_vm2, %v408_v24 }
  0xa3   : > { %998 = vmatpush3.bf16.msra.mxu1 %v533_v23  ;;  %999 = vmatprep.mubr.msk.bf16.mxu1 %vm1217_vm0, %v1216_v3 }
  0xa4   : > { %1009 = vmatprep.subr.bf16.mxu1 %v1216_v3 }
  0xa5   : > { %v468_v27 = vpop.permute.xlu1 %467 }
  0xa7   : > { %v241_v26 = vpop.permute.xlu0 %240 }
  0xa8   : > { %970 = vmatmul.mubr.msk.bf16.vlgmr.msra.gmra.mxu0 %vm242_vm2, %v241_v26 }
  0xa9   : > { %980 = vmatpush3.bf16.msra.mxu0 %v353_v25  ;;  %981 = vmatprep.mubr.msk.bf16.mxu0 %vm1217_vm0, %v1216_v3  ;;  %v528_v30 = vpop.permute.xlu1 %527 }
  0xaa   : > { %991 = vmatprep.subr.bf16.mxu0 %v1216_v3  ;;  %1000 = vmatmul.mubr.msk.bf16.vlgmr.msra.gmra.mxu1 %vm242_vm2, %v528_v30 }
  0xab   : > { %v348_v28 = vpop.permute.xlu0 %347  ;;  %1011 = vmatprep.mubr.msk.bf16.mxu1 %vm1217_vm0, %v1216_v3 }
  0xad   : > { %v666_v33 = vpop.permute.xlu1 %665 }
  0xae   : > { %v671_v34 = vsel %vm246_vm1, %v666_v33, 0 }
  0xaf   : > { %v597_v32 = vpop.permute.xlu0 %596  ;;  %1010 = vmatpush3.bf16.msra.mxu1 %v671_v34 }
  0xb0   : > { %982 = vmatmul.mubr.msk.bf16.vlgmr.msra.gmra.mxu0 %vm242_vm2, %v348_v28  ;;  %v602_v37 = vsel %vm246_vm1, %v597_v32, 0 }
  0xb1   : > { %992 = vmatpush3.bf16.msra.mxu0 %v473_v31  ;;  %993 = vmatprep.mubr.msk.bf16.mxu0 %vm1217_vm0, %v1216_v3  ;;  %v656_v36 = vpop.permute.xlu1 %655 }
  0xb2   : > { %1003 = vmatprep.subr.bf16.mxu0 %v1216_v3  ;;  %1012 = vmatmul.mubr.msk.bf16.vlgmr.msra.gmra.mxu1 %vm242_vm2, %v656_v36 }
  0xb3   : > { %v587_v35 = vpop.permute.xlu0 %586 }
  0xb7   : > { %v735_v38 = vpop.permute.xlu0 %734 }
  0xb8   : > { %994 = vmatmul.mubr.msk.bf16.vlgmr.msra.gmra.mxu0 %vm242_vm2, %v468_v27  ;;  %v740_v39 = vsel %vm246_vm1, %v735_v38, 0 }
  0xb9   : > { %1004 = vmatpush3.bf16.msra.mxu0 %v602_v37  ;;  %1005 = vmatprep.mubr.msk.bf16.mxu0 %vm1217_vm0, %v1216_v3 }
  0xba   : > { %1015 = vmatprep.subr.bf16.mxu0 %v1216_v3 }
  0xbb   : > { %v725_v40 = vpop.permute.xlu0 %724 }
  0xbe   : > { %v795_v23 = vpop.permute.xlu1 %794 }
  0xc0   : > { %1006 = vmatmul.mubr.msk.bf16.vlgmr.msra.gmra.mxu0 %vm242_vm2, %v587_v35 }
  0xc1   : > { %1016 = vmatpush3.bf16.msra.mxu0 %v740_v39  ;;  %1017 = vmatprep.mubr.msk.bf16.mxu0 %vm1217_vm0, %v1216_v3 }
  0xc8   : > { %1018 = vmatmul.mubr.msk.bf16.vlgmr.msra.gmra.mxu0 %vm242_vm2, %v725_v40 }
  0xf2   : > { %v330_v41 = vpop.f32.mrf.mxu1 }
  0xf4   : > { %v977_v42 = vpop.f32.mrf.mxu1 }
  0xf6   : > { %v333_v43 = vpop.f32.mrf.mxu1 }
  0xf8   : > { %v978_v44 = vpop.f32.mrf.mxu1 }
 0x162   : > { %v449_v45 = vpop.f32.mrf.mxu1 }
 0x164   : > { %v989_v47 = vpop.f32.mrf.mxu1 }
 0x166   : > { %v452_v49 = vpop.f32.mrf.mxu1 }
 0x168   : > { %v284_v46 = vpop.f32.mrf.mxu0  ;;  %v990_v51 = vpop.f32.mrf.mxu1 }
 0x169   : > { %v331_v60 = vadd.f32 %v330_v41, %v284_v46 }
 0x16a   : > { %v971_v48 = vpop.f32.mrf.mxu0  ;;  %v569_v53 = vpop.f32.mrf.mxu1 }
 0x16c   : > { %v287_v50 = vpop.f32.mrf.mxu0  ;;  %v1001_v55 = vpop.f32.mrf.mxu1 }
 0x16e   : > { %v972_v52 = vpop.f32.mrf.mxu0  ;;  %v572_v57 = vpop.f32.mrf.mxu1 }
 0x170   : > { %v389_v54 = vpop.f32.mrf.mxu0  ;;  %v1002_v59 = vpop.f32.mrf.mxu1 }
 0x171   : > { %v395_v63 = vadd.f32 %v389_v54, %v331_v60 }
 0x172   : > { %v983_v56 = vpop.f32.mrf.mxu0  ;;  %v707_v62 = vpop.f32.mrf.mxu1 }
 0x173   : > { %v455_v4 = vadd.f32 %v449_v45, %v395_v63 }
 0x174   : > { %v392_v58 = vpop.f32.mrf.mxu0  ;;  %v1013_v1 = vpop.f32.mrf.mxu1 }
 0x176   : > { %v984_v61 = vpop.f32.mrf.mxu0  ;;  %v710_v3 = vpop.f32.mrf.mxu1 }
 0x178   : > { %v509_v0 = vpop.f32.mrf.mxu0  ;;  %v1014_v6 = vpop.f32.mrf.mxu1 }
 0x179   : > { %v515_v7 = vadd.f32 %v509_v0, %v455_v4 }
 0x17a   : > { %v995_v2 = vpop.f32.mrf.mxu0 }
 0x17b   : > { %v575_v10 = vadd.f32 %v569_v53, %v515_v7 }
 0x17c   : > { %v512_v5 = vpop.f32.mrf.mxu0 }
 0x17e   : > { %v996_v8 = vpop.f32.mrf.mxu0 }
 0x180   : > { %v638_v9 = vpop.f32.mrf.mxu0 }
 0x181   : > { %v644_v12 = vadd.f32 %v638_v9, %v575_v10 }
 0x182   : > { %v1007_v11 = vpop.f32.mrf.mxu0 }
 0x183   : > { %v713_v15 = vadd.f32 %v707_v62, %v644_v12 }
 0x184   : > { %v641_v13 = vpop.f32.mrf.mxu0 }
 0x186   : > { %v1008_v14 = vpop.f32.mrf.mxu0 }
 0x188   : > { %v776_v16 = vpop.f32.mrf.mxu0 }
 0x189   : > { %v782_v18 = vadd.f32 %v776_v16, %v713_v15 }
 0x18a   : > { %v1019_v19 = vpop.f32.mrf.mxu0 }
 0x18b   : > { %v784_v20 = vadd.f32 %v783_v17, %v782_v18 }
 0x18c   : > { %v779_v21 = vpop.f32.mrf.mxu0 }
 0x18d   : > { %786 = vst.msk [vmem:[#allocation2] sm:$0xf] %vm226_vm3, %v784_v20 }
 0x18e   : > { %v1020_v22 = vpop.f32.mrf.mxu0 }
 0x194   : > { %v790_v24 = vld [vmem:[#allocation2] sm:$0xf] }
 0x195   : > { %v797_v25 = vadd.f32 %v795_v23, %v790_v24 }
 0x197   : > { %vm798_vm4 = vcmp.ge.f32.partialorder %v797_v25, 0.0  ;;  %v799_v26 = vmul.f32 0.01, %v797_v25 }
 0x199   : > { %v800_v27 = vsel %vm798_vm4, %v797_v25, %v799_v26 }
 0x19a   : > { %801 = vst.msk [vmem:[%s216_s24] sm:$0xf] %vm226_vm3, %v800_v27 }
 0x19b   : > { %1143 = shalt.err (!%p1140_p6)
}
 0x19c   : > { %s1144_s19 = scalar_lea.hbm %s1413_s8, 64  ;;  %s1148_s22 = scalar_lea.hbm %s1459_s3, 128 }
 0x19d   : > { %p1145_p4 = scmp.ne.s32.totalorder %s1413_s8, %s1144_s19  ;;  %p1149_p13 = scmp.lt.s32.totalorder %s1413_s8, %s1459_s3 }
 0x19e   : > { %p1150_p2 = scmp.lt.s32.totalorder %s1148_s22, %s1144_s19 }
 0x19f   : > { %p1146_p7 = pnand %p1145_p4, %p1299_p9 }
 0x1a0   : > { %p1151_p8 = por %p1150_p2, %p1149_p13 }
 0x1a1   : > { %p1147_p10 = pneg %p1146_p7 }
 0x1a3   : > { %p1152_p12 = pnand %p1151_p8, %p1147_p10 }
 0x1a5   : > { %1155 = shalt.err (!%p1152_p12)
}
 0x1a6   : > { %1026 = dma.vmem_to_hbm [thread:$0]  (%p1299_p9), %s817_s4, 64, %s1413_s8, %s803_s9  }
 0x1a7 PF: > { %s828_s30 = sand.u32 1, %s1190_s12   ;;  %p1465_p0 = scmp.ge.s32.totalorder %s1210_s17, 2 }
 0x1a8   : > { %s829_s5 = scalar_lea.sflag [#allocation5], %s828_s30 }
 0x1a9   : > { %p1033_p1 = pnand %p1465_p0, %p1306_p11 }
 0x1ab   : > { %p1034_p3 = pneg %p1033_p1 }
 0x1ad   : > { %1185 = dma.done.wait (%p1034_p3), %s829_s5, 64  }
 0x1ae   : > { %1187 = vsyncadd (%p1034_p3), %s829_s5, 4294967232  ;;  %s19_s17 = sadd.s32 1, %s1210_s17   ;;  %s1466_s12 = smov %s1194_s13 }
 0x1af   : > { %p16_p5 = scmp.ge.s32.totalorder %s19_s17, 4   ;;  %s1467_s13 = smov %s1198_s14 }
 0x1b0   : > { %s1468_s14 = smov %s1304_s26  ;;  %s1469_s15 = smov %s1206_s16 }
 0x1b1   : > { %s1470_s16 = smov %s1472_s20  ;;  %18 = sbr.rel (!%p16_p5) target bundleno = 6 (0x6), region = 93 }
 0x1b6   :  { %834 = vsyncpa [#allocation4], 1 }
 0x1b7   :  { %836 = vsyncpa [#allocation4 + $0x1], 1 }
 0x1b8   :  { %837 = vsyncpa [#allocation5], 1 }
 0x1b9   :  { %839 = vsyncpa [#allocation5 + $0x1], 1 }

</bundles_post_ra>
